<compile_context>
chip_gen: v7x
topology: tpu7x:2x2x1
jax: 0.10.0
libtpu: 0.0.40
codegen_flags: <defaults>
</compile_context>

<pallas_src>
import math

import jax
import jax.numpy as jnp
from jax import lax
from jax.experimental import pallas as pl
from jax.experimental.pallas import tpu as pltpu

LANE = 128
MAX_TQ = 256          # query-row tile cap (fills the 256-wide MXU on v6e/v7x)


def _round_up(n, m):
    return ((n + m - 1) // m) * m


def _pad_cols(x, cols):
    return jnp.pad(x, ((0, 0), (0, cols - x.shape[1])))


def _pad_rows(x, rows):
    return jnp.pad(x, ((0, rows - x.shape[0]), (0, 0)))


def _make_fusion_kernel(tq, n_valid_keys, n_total_keys):
    """Build the fused attention kernel.

    tq           : query rows handled per grid step (static)
    n_valid_keys : number of real (unpadded) key rows == batch size B
    n_total_keys : padded key rows (== rows of the resident text block)
    """
    needs_key_mask = n_total_keys > n_valid_keys

    def kernel(text_ref, mol_ref,
               wq_ref, bq_ref, wk_ref, bk_ref, wv_ref, bv_ref,
               out_ref, k_scr, v_scr):
        i = pl.program_id(0)

        # --- K / V projections: done once, kept resident in VMEM scratch. ----
        @pl.when(i == 0)
        def _():
            k = jnp.dot(text_ref[...], wk_ref[...],
                        preferred_element_type=jnp.float32) + bk_ref[...]
            v = jnp.dot(mol_ref[...], wv_ref[...],
                        preferred_element_type=jnp.float32) + bv_ref[...]
            k_scr[...] = k.astype(k_scr.dtype)
            v_scr[...] = v.astype(v_scr.dtype)

        # --- Q for this query-row block (scale already folded into Wq/bq). ---
        row0 = pl.multiple_of(i * tq, tq)
        x_q = text_ref[pl.ds(row0, tq), :]
        q = jnp.dot(x_q, wq_ref[...],
                    preferred_element_type=jnp.float32) + bq_ref[...]

        # scores = Q @ K^T without materializing K.T (contract last dims).
        scores = lax.dot_general(q.astype(k_scr.dtype), k_scr[...],
                                 (((1,), (1,)), ((), ())),
                                 preferred_element_type=jnp.float32)

        if needs_key_mask:   # static: only when key rows were zero-padded
            col = lax.broadcasted_iota(jnp.int32, scores.shape, 1)
            scores = jnp.where(col < n_valid_keys, scores, -jnp.inf)

        # Numerically-stable softmax along the key axis; exact reciprocal
        # (EUP / VALU are nowhere near the bottleneck in this kernel).
        scores = scores - jnp.max(scores, axis=-1, keepdims=True)
        p = jnp.exp(scores)
        attn = p / jnp.sum(p, axis=-1, keepdims=True)

        out_ref[...] = jnp.dot(attn.astype(v_scr.dtype), v_scr[...],
                               preferred_element_type=jnp.float32
                               ).astype(out_ref.dtype)

    return kernel


def attention_fusion(molecule_embedding, text_embedding, params, d_model,
                     *, use_bf16=False):
    """Fused forward of AttentionFusionModel.

    molecule_embedding: (B, d_molecule) f32
    text_embedding    : (B, d_text)     f32
    params: wq (d_text, d_model), bq (1, d_model), wk, bk,
            wv (d_molecule, d_model), bv (1, d_model)
    """
    B, d_text = text_embedding.shape
    _, d_molecule = molecule_embedding.shape

    # Only d_model (lane dim of Q/K/V/output) is padded to 128 for lane-dense
    # stores; d_text / d_molecule stay unpadded (contraction / full-extent dims).
    d_model_p = _round_up(d_model, LANE)

    # Size-driven query tile: one grid step for small B, 256-row tiles otherwise.
    tq = min(MAX_TQ, _round_up(B, 8))
    B_p = _round_up(B, tq)
    num_q_blocks = B_p // tq

    inv_scale = 1.0 / math.sqrt(float(d_model))
    op_dtype = jnp.bfloat16 if use_bf16 else jnp.float32
    itemsize = 2 if use_bf16 else 4

    # Fold 1/sqrt(d_model) into the Q projection; pad only the d_model axis.
    wq = _pad_cols(params["wq"] * inv_scale, d_model_p).astype(op_dtype)
    wk = _pad_cols(params["wk"], d_model_p).astype(op_dtype)
    wv = _pad_cols(params["wv"], d_model_p).astype(op_dtype)
    bq = _pad_cols(params["bq"] * inv_scale, d_model_p)      # biases stay f32
    bk = _pad_cols(params["bk"], d_model_p)
    bv = _pad_cols(params["bv"], d_model_p)

    text_p = _pad_rows(text_embedding, B_p).astype(op_dtype)
    mol_p = _pad_rows(molecule_embedding, B_p).astype(op_dtype)

    kernel = _make_fusion_kernel(tq, B, B_p)

    # K/V projections counted once (they run once); text read once.
    flops = (2 * B_p * d_text * d_model_p          # Q
             + 2 * B_p * d_text * d_model_p        # K (once)
             + 2 * B_p * d_molecule * d_model_p    # V (once)
             + 2 * B_p * B_p * d_model_p           # Q @ K^T
             + 2 * B_p * B_p * d_model_p)          # A @ V
    bytes_accessed = (itemsize * (text_p.size + mol_p.size
                                  + wq.size + wk.size + wv.size)
                      + 4 * (bq.size + bk.size + bv.size)
                      + 4 * B_p * d_model_p)
    cost = pl.CostEstimate(flops=flops, transcendentals=B_p * B_p,
                           bytes_accessed=bytes_accessed)

    # Resident footprint (inputs double-buffered by default) + headroom.
    resident = (itemsize * (text_p.size + mol_p.size
                            + wq.size + wk.size + wv.size)
                + 4 * (bq.size + bk.size + bv.size)
                + itemsize * 2 * B_p * d_model_p          # K/V scratch
                + 4 * 2 * tq * d_model_p)                 # output block buffers
    vmem_limit = int(min(128 * 1024 * 1024,
                         max(32 * 1024 * 1024, 2 * resident + (8 << 20))))

    out_padded = pl.pallas_call(
        kernel,
        out_shape=jax.ShapeDtypeStruct((B_p, d_model_p), jnp.float32),
        grid=(num_q_blocks,),
        in_specs=[
            # TODO(synk): pipeline_mode=pl.Buffered(1) on these grid-invariant
            # operands would single-buffer them and halve their VMEM footprint.
            pl.BlockSpec((B_p, d_text), lambda i: (0, 0)),            # text (Q+K src)
            pl.BlockSpec((B_p, d_molecule), lambda i: (0, 0)),        # molecule (V src)
            pl.BlockSpec((d_text, d_model_p), lambda i: (0, 0)),      # wq (pre-scaled)
            pl.BlockSpec((1, d_model_p), lambda i: (0, 0)),           # bq (pre-scaled)
            pl.BlockSpec((d_text, d_model_p), lambda i: (0, 0)),      # wk
            pl.BlockSpec((1, d_model_p), lambda i: (0, 0)),           # bk
            pl.BlockSpec((d_molecule, d_model_p), lambda i: (0, 0)),  # wv
            pl.BlockSpec((1, d_model_p), lambda i: (0, 0)),           # bv
        ],
        out_specs=pl.BlockSpec((tq, d_model_p), lambda i: (i, 0)),
        scratch_shapes=[
            pltpu.VMEM((B_p, d_model_p), op_dtype),   # K (resident across steps)
            pltpu.VMEM((B_p, d_model_p), op_dtype),   # V (resident across steps)
        ],
        compiler_params=pltpu.CompilerParams(
            # K/V are written at step 0 and reused -> query axis is sequential.
            dimension_semantics=("arbitrary",),
            vmem_limit_bytes=vmem_limit),
        cost_estimate=cost,
    )(text_p, mol_p, wq, bq, wk, bk, wv, bv)

    # TODO(synk): for very large B the resident K/V set no longer fits VMEM
    # (v7x 64 MiB) -- switch to a flash-style online softmax with a tiled key axis.
    return out_padded[:B, :d_model]


def init_params(key, d_molecule, d_text, d_model):
    """Deterministic parameter init (mimics nn.Linear uniform fan-in init)."""
    ks = jax.random.split(key, 6)

    def lin(kw, kb, d_in, d_out):
        bound = 1.0 / math.sqrt(d_in)
        w = jax.random.uniform(kw, (d_in, d_out), jnp.float32, -bound, bound)
        b = jax.random.uniform(kb, (1, d_out), jnp.float32, -bound, bound)
        return w, b

    wq, bq = lin(ks[0], ks[1], d_text, d_model)
    wk, bk = lin(ks[2], ks[3], d_text, d_model)
    wv, bv = lin(ks[4], ks[5], d_molecule, d_model)
    return {"wq": wq, "bq": bq, "wk": wk, "bk": bk, "wv": wv, "bv": bv}


def reference(molecule_embedding, text_embedding, params, d_model):
    """Pure-JAX reference matching the PyTorch forward."""
    q = text_embedding @ params["wq"] + params["bq"]
    k = text_embedding @ params["wk"] + params["bk"]
    v = molecule_embedding @ params["wv"] + params["bv"]
    scores = (q @ k.T) / jnp.sqrt(jnp.float32(d_model))
    w = jax.nn.softmax(scores, axis=-1)
    return w @ v


if __name__ == "__main__":
    d_molecule, d_text, d_model = 16, 32, 32

    key = jax.random.PRNGKey(0)
    k_mol, k_txt, k_par = jax.random.split(key, 3)
    params = init_params(k_par, d_molecule, d_text, d_model)

    # Primary check: B a multiple of 8 -> single grid step, no key padding.
    B = 16
    mol = jax.random.normal(k_mol, (B, d_molecule), jnp.float32)
    txt = jax.random.normal(k_txt, (B, d_text), jnp.float32)
    out = jax.block_until_ready(attention_fusion(mol, txt, params, d_model))
    ref = reference(mol, txt, params, d_model)
    assert out.shape == (B, d_model)
    assert jnp.allclose(out, ref, atol=1e-4, rtol=1e-4), "mismatch vs reference (B=16)"

    # Secondary check: ragged batch -> padded key rows excluded via -inf mask.
    B2 = 12
    mol2 = jax.random.normal(jax.random.PRNGKey(1), (B2, d_molecule), jnp.float32)
    txt2 = jax.random.normal(jax.random.PRNGKey(2), (B2, d_text), jnp.float32)
    out2 = jax.block_until_ready(attention_fusion(mol2, txt2, params, d_model))
    ref2 = reference(mol2, txt2, params, d_model)
    assert jnp.allclose(out2, ref2, atol=1e-4, rtol=1e-4), "mismatch vs reference (B=12)"

    # TODO(synk): text_embedding() helper (SciBERT tokenize + pooler) is an
    # external pretrained model, not part of this module's forward; not ported.
    print("KERNEL_OK")
</pallas_src>

<mosaic_0001>
module attributes {stable_mosaic.version = 11 : i64} {
  func.func @kernel(%arg0: i32, %arg1: memref<16x32xf32, #tpu.memory_space<vmem>>, %arg2: memref<16x16xf32, #tpu.memory_space<vmem>>, %arg3: memref<32x128xf32, #tpu.memory_space<vmem>>, %arg4: memref<1x128xf32, #tpu.memory_space<vmem>>, %arg5: memref<32x128xf32, #tpu.memory_space<vmem>>, %arg6: memref<1x128xf32, #tpu.memory_space<vmem>>, %arg7: memref<16x128xf32, #tpu.memory_space<vmem>>, %arg8: memref<1x128xf32, #tpu.memory_space<vmem>>, %arg9: memref<16x128xf32, #tpu.memory_space<vmem>>, %arg10: memref<16x128xf32, #tpu.memory_space<vmem>>, %arg11: memref<16x128xf32, #tpu.memory_space<vmem>>) attributes {dimension_semantics = [#tpu.dimension_semantics<arbitrary>], iteration_bounds = array<i64: 1>, scalar_prefetch = 0 : i64, scratch_operands = 2 : i64, tpu.core_type = #tpu.core_type<tc>, window_params = [{pipeline_mode = #tpu.pipeline_mode<synchronous>, transform_indices = @transform_0, window_bounds = array<i64: 16, 32>}, {pipeline_mode = #tpu.pipeline_mode<synchronous>, transform_indices = @transform_1, window_bounds = array<i64: 16, 16>}, {pipeline_mode = #tpu.pipeline_mode<synchronous>, transform_indices = @transform_2, window_bounds = array<i64: 32, 128>}, {pipeline_mode = #tpu.pipeline_mode<synchronous>, transform_indices = @transform_3, window_bounds = array<i64: 1, 128>}, {pipeline_mode = #tpu.pipeline_mode<synchronous>, transform_indices = @transform_4, window_bounds = array<i64: 32, 128>}, {pipeline_mode = #tpu.pipeline_mode<synchronous>, transform_indices = @transform_5, window_bounds = array<i64: 1, 128>}, {pipeline_mode = #tpu.pipeline_mode<synchronous>, transform_indices = @transform_6, window_bounds = array<i64: 16, 128>}, {pipeline_mode = #tpu.pipeline_mode<synchronous>, transform_indices = @transform_7, window_bounds = array<i64: 1, 128>}, {transform_indices = @transform_8, window_bounds = array<i64: 16, 128>}]} {
    %c0_i32 = arith.constant 0 : i32
    %0 = arith.cmpi eq, %arg0, %c0_i32 : i32
    %1 = arith.extui %0 : i1 to i32
    %c0_i32_0 = arith.constant 0 : i32
    %2 = arith.cmpi ne, %1, %c0_i32_0 : i32
    scf.if %2 {
      %c0_15 = arith.constant 0 : index
      %c0_16 = arith.constant 0 : index
      %26 = vector.load %arg1[%c0_15, %c0_16] : memref<16x32xf32, #tpu.memory_space<vmem>>, vector<16x32xf32>
      %c0_17 = arith.constant 0 : index
      %c0_18 = arith.constant 0 : index
      %27 = vector.load %arg5[%c0_17, %c0_18] : memref<32x128xf32, #tpu.memory_space<vmem>>, vector<32x128xf32>
      %cst_19 = arith.constant dense<0.000000e+00> : vector<16x128xf32>
      %28 = tpu.matmul %26, %27, %cst_19 {dimension_numbers = #tpu.dot_dimension_numbers<[1], [0], [0], [1], [0, 0, 1, 1], [], []>} : vector<16x32xf32>, vector<32x128xf32>, vector<16x128xf32> -> vector<16x128xf32>
      %c0_20 = arith.constant 0 : index
      %c0_21 = arith.constant 0 : index
      %29 = vector.load %arg6[%c0_20, %c0_21] : memref<1x128xf32, #tpu.memory_space<vmem>>, vector<1x128xf32>
      %30 = vector.broadcast %29 : vector<1x128xf32> to vector<16x128xf32>
      %31 = arith.addf %28, %30 : vector<16x128xf32>
      %c0_22 = arith.constant 0 : index
      %c0_23 = arith.constant 0 : index
      %32 = vector.load %arg2[%c0_22, %c0_23] : memref<16x16xf32, #tpu.memory_space<vmem>>, vector<16x16xf32>
      %c0_24 = arith.constant 0 : index
      %c0_25 = arith.constant 0 : index
      %33 = vector.load %arg7[%c0_24, %c0_25] : memref<16x128xf32, #tpu.memory_space<vmem>>, vector<16x128xf32>
      %cst_26 = arith.constant dense<0.000000e+00> : vector<16x128xf32>
      %34 = tpu.matmul %32, %33, %cst_26 {dimension_numbers = #tpu.dot_dimension_numbers<[1], [0], [0], [1], [0, 0, 1, 1], [], []>} : vector<16x16xf32>, vector<16x128xf32>, vector<16x128xf32> -> vector<16x128xf32>
      %c0_27 = arith.constant 0 : index
      %c0_28 = arith.constant 0 : index
      %35 = vector.load %arg8[%c0_27, %c0_28] : memref<1x128xf32, #tpu.memory_space<vmem>>, vector<1x128xf32>
      %36 = vector.broadcast %35 : vector<1x128xf32> to vector<16x128xf32>
      %37 = arith.addf %34, %36 : vector<16x128xf32>
      %c0_29 = arith.constant 0 : index
      %c0_30 = arith.constant 0 : index
      %38 = vector.load %arg10[%c0_29, %c0_30] : memref<16x128xf32, #tpu.memory_space<vmem>>, vector<16x128xf32>
      tpu.vector_store %arg10[%c0_29, %c0_30], %31 {strides = array<i32>} : memref<16x128xf32, #tpu.memory_space<vmem>>, vector<16x128xf32>,
      %c0_31 = arith.constant 0 : index
      %c0_32 = arith.constant 0 : index
      %39 = vector.load %arg11[%c0_31, %c0_32] : memref<16x128xf32, #tpu.memory_space<vmem>>, vector<16x128xf32>
      tpu.vector_store %arg11[%c0_31, %c0_32], %37 {strides = array<i32>} : memref<16x128xf32, #tpu.memory_space<vmem>>, vector<16x128xf32>,
    } else {
    }
    %c16_i32 = arith.constant 16 : i32
    %3 = arith.muli %arg0, %c16_i32 : i32
    %4 = tpu.assume_multiple %3, 16 : i32
    %5 = arith.index_cast %4 : i32 to index
    %c0 = arith.constant 0 : index
    %6 = vector.load %arg1[%5, %c0] : memref<16x32xf32, #tpu.memory_space<vmem>>, vector<16x32xf32>
    %c0_1 = arith.constant 0 : index
    %c0_2 = arith.constant 0 : index
    %7 = vector.load %arg3[%c0_1, %c0_2] : memref<32x128xf32, #tpu.memory_space<vmem>>, vector<32x128xf32>
    %cst = arith.constant dense<0.000000e+00> : vector<16x128xf32>
    %8 = tpu.matmul %6, %7, %cst {dimension_numbers = #tpu.dot_dimension_numbers<[1], [0], [0], [1], [0, 0, 1, 1], [], []>} : vector<16x32xf32>, vector<32x128xf32>, vector<16x128xf32> -> vector<16x128xf32>
    %c0_3 = arith.constant 0 : index
    %c0_4 = arith.constant 0 : index
    %9 = vector.load %arg4[%c0_3, %c0_4] : memref<1x128xf32, #tpu.memory_space<vmem>>, vector<1x128xf32>
    %10 = vector.broadcast %9 : vector<1x128xf32> to vector<16x128xf32>
    %11 = arith.addf %8, %10 : vector<16x128xf32>
    %c0_5 = arith.constant 0 : index
    %c0_6 = arith.constant 0 : index
    %12 = vector.load %arg10[%c0_5, %c0_6] : memref<16x128xf32, #tpu.memory_space<vmem>>, vector<16x128xf32>
    %cst_7 = arith.constant dense<0.000000e+00> : vector<16x16xf32>
    %13 = tpu.matmul %11, %12, %cst_7 {dimension_numbers = #tpu.dot_dimension_numbers<[1], [1], [0], [0], [0, 0, 1, 0], [], []>} : vector<16x128xf32>, vector<16x128xf32>, vector<16x16xf32> -> vector<16x16xf32>
    %cst_8 = arith.constant dense<0xFF800000> : vector<16xf32>
    %14 = vector.multi_reduction <maximumf>, %13, %cst_8 [1] : vector<16x16xf32> to vector<16xf32>
    %15 = vector.shape_cast %14 : vector<16xf32> to vector<16x1xf32>
    %16 = vector.broadcast %15 : vector<16x1xf32> to vector<16x16xf32>
    %17 = arith.subf %13, %16 : vector<16x16xf32>
    %18 = math.exp %17 : vector<16x16xf32>
    %cst_9 = arith.constant dense<0.000000e+00> : vector<16xf32>
    %19 = vector.multi_reduction <add>, %18, %cst_9 [1] : vector<16x16xf32> to vector<16xf32>
    %20 = vector.shape_cast %19 : vector<16xf32> to vector<16x1xf32>
    %21 = vector.broadcast %20 : vector<16x1xf32> to vector<16x16xf32>
    %22 = arith.divf %18, %21 : vector<16x16xf32>
    %c0_10 = arith.constant 0 : index
    %c0_11 = arith.constant 0 : index
    %23 = vector.load %arg11[%c0_10, %c0_11] : memref<16x128xf32, #tpu.memory_space<vmem>>, vector<16x128xf32>
    %cst_12 = arith.constant dense<0.000000e+00> : vector<16x128xf32>
    %24 = tpu.matmul %22, %23, %cst_12 {dimension_numbers = #tpu.dot_dimension_numbers<[1], [0], [0], [1], [0, 0, 1, 1], [], []>} : vector<16x16xf32>, vector<16x128xf32>, vector<16x128xf32> -> vector<16x128xf32>
    %c0_13 = arith.constant 0 : index
    %c0_14 = arith.constant 0 : index
    %25 = vector.load %arg9[%c0_13, %c0_14] : memref<16x128xf32, #tpu.memory_space<vmem>>, vector<16x128xf32>
    tpu.vector_store %arg9[%c0_13, %c0_14], %24 {strides = array<i32>} : memref<16x128xf32, #tpu.memory_space<vmem>>, vector<16x128xf32>,
    return
  }
  func.func @transform_0(%arg0: i32) -> (i32, i32) {
    %c0_i32 = arith.constant 0 : i32
    %c0_i32_0 = arith.constant 0 : i32
    %c0_i32_1 = arith.constant 0 : i32
    return %c0_i32, %c0_i32_0 : i32, i32
  }
  func.func @transform_1(%arg0: i32) -> (i32, i32) {
    %c0_i32 = arith.constant 0 : i32
    %c0_i32_0 = arith.constant 0 : i32
    %c0_i32_1 = arith.constant 0 : i32
    return %c0_i32, %c0_i32_0 : i32, i32
  }
  func.func @transform_2(%arg0: i32) -> (i32, i32) {
    %c0_i32 = arith.constant 0 : i32
    %c0_i32_0 = arith.constant 0 : i32
    %c0_i32_1 = arith.constant 0 : i32
    return %c0_i32, %c0_i32_0 : i32, i32
  }
  func.func @transform_3(%arg0: i32) -> (i32, i32) {
    %c0_i32 = arith.constant 0 : i32
    %c0_i32_0 = arith.constant 0 : i32
    %c0_i32_1 = arith.constant 0 : i32
    return %c0_i32, %c0_i32_0 : i32, i32
  }
  func.func @transform_4(%arg0: i32) -> (i32, i32) {
    %c0_i32 = arith.constant 0 : i32
    %c0_i32_0 = arith.constant 0 : i32
    %c0_i32_1 = arith.constant 0 : i32
    return %c0_i32, %c0_i32_0 : i32, i32
  }
  func.func @transform_5(%arg0: i32) -> (i32, i32) {
    %c0_i32 = arith.constant 0 : i32
    %c0_i32_0 = arith.constant 0 : i32
    %c0_i32_1 = arith.constant 0 : i32
    return %c0_i32, %c0_i32_0 : i32, i32
  }
  func.func @transform_6(%arg0: i32) -> (i32, i32) {
    %c0_i32 = arith.constant 0 : i32
    %c0_i32_0 = arith.constant 0 : i32
    %c0_i32_1 = arith.constant 0 : i32
    return %c0_i32, %c0_i32_0 : i32, i32
  }
  func.func @transform_7(%arg0: i32) -> (i32, i32) {
    %c0_i32 = arith.constant 0 : i32
    %c0_i32_0 = arith.constant 0 : i32
    %c0_i32_1 = arith.constant 0 : i32
    return %c0_i32, %c0_i32_0 : i32, i32
  }
  func.func @transform_8(%arg0: i32) -> (i32, i32) {
    %c0_i32 = arith.constant 0 : i32
    %c0_i32_0 = arith.constant 0 : i32
    return %arg0, %c0_i32 : i32, i32
  }
}

</mosaic_0001>

<bundles_post_ra>
// kernel: tpu_custom_call.1
= control target key start
LH: loop header
LB: loop body
LE: loop exit
PB: predicated region body
PF: predicated region fallthrough
CT: control target
= control target key end

     0   :  { %13 = vsyncpa [#allocation5], 0  ;;  %s989_s0 = inlined_call_operand.hbm [shape: f32[16,32], index: 0, kind: input, shape index: {}]   ;;  %s990_s1 = inlined_call_operand.hbm [shape: f32[16,16], index: 1, kind: input, shape index: {}]   ;;  %s991_s2 = inlined_call_operand.hbm [shape: f32[32,128], index: 2, kind: input, shape index: {}]   ;;  %s992_s3 = inlined_call_operand.vmem [shape: f32[1,128], index: 3, kind: input, shape index: {}]   ;;  %s993_s4 = inlined_call_operand.hbm [shape: f32[32,128], index: 4, kind: input, shape index: {}]   ;;  %s994_s5 = inlined_call_operand.vmem [shape: f32[1,128], index: 5, kind: input, shape index: {}]   ;;  %s995_s6 = inlined_call_operand.vmem [shape: f32[16,128], index: 6, kind: input, shape index: {}]   ;;  %s996_s7 = inlined_call_operand.vmem [shape: f32[1,128], index: 7, kind: input, shape index: {}]   ;;  %s997_s8 = inlined_call_operand.hbm [shape: f32[16,128], index: 8, kind: output, shape index: {}]  }
   0x1   :  { %14 = vsyncpa [#allocation8], 0 }
   0x2   :  { %15 = vsyncpa [#allocation11], 0 }
   0x3   :  { %16 = vsyncpa [#allocation6], 0  ;;  %s821_s27 = smov [#allocation7]   ;;  %s822_s29 = smov [#allocation4]  }
   0x4   :  { %s34_s28 = sshll.u32 %s821_s27, 4  ;;  %s22_s30 = sshll.u32 %s822_s29, 4  ;;  %s35_s28 = int_to_ptr.vmem [resolvable:$true] %s34_s28  ;;  %s873_s30 = int_to_ptr.vmem [resolvable:$true] %s22_s30 }
   0x5   :  { %s703_s11 = scalar_lea.hbm %s990_s1, 256 }
   0x6   :  { %p704_p0 = scmp.ne.s32.totalorder %s990_s1, %s703_s11  ;;  %p707_p1 = scmp.lt.u32.totalorder %s703_s11, %s990_s1 }
   0x8   :  { %p709_p2 = pnand %p707_p1, %p704_p0 }
   0xa   :  { %712 = shalt.err (!%p709_p2)
}
   0xb   :  { %s713_s16 = scalar_lea.vmem %s35_s28, 256  ;;  %p718_p4 = scmp.lt.s32.totalorder %s35_s28, %s35_s28 }
   0xc   :  { %p714_p3 = scmp.ne.s32.totalorder %s35_s28, %s713_s16  ;;  %p719_p5 = scmp.lt.s32.totalorder %s713_s16, %s713_s16 }
   0xe   :  { %p720_p6 = por %p719_p5, %p718_p4 }
  0x10   :  { %p721_p7 = pnand %p720_p6, %p714_p3 }
  0x12   :  { %724 = shalt.err (!%p721_p7)
}
  0x13   :  { %s823_s17 = smov 128   ;;  %s824_s18 = smov 8  }
  0x14   :  { %40 = dma.hbm_to_vmem [thread:$0]  %s990_s1, 256, %s35_s28, [#allocation8], %s823_s17, %s823_s17, %s824_s18  }
  0x15   :  { %s725_s23 = scalar_lea.hbm %s989_s0, 256 }
  0x16   :  { %p726_p8 = scmp.ne.s32.totalorder %s989_s0, %s725_s23  ;;  %p729_p9 = scmp.lt.u32.totalorder %s725_s23, %s989_s0 }
  0x18   :  { %p731_p10 = pnand %p729_p9, %p726_p8 }
  0x1a   :  { %734 = shalt.err (!%p731_p10)
}
  0x1b   :  { %s735_s29 = scalar_lea.vmem %s873_s30, 256  ;;  %p740_p12 = scmp.lt.s32.totalorder %s873_s30, %s873_s30 }
  0x1c   :  { %p736_p11 = scmp.ne.s32.totalorder %s873_s30, %s735_s29  ;;  %p741_p13 = scmp.lt.s32.totalorder %s735_s29, %s735_s29 }
  0x1e   :  { %p742_p0 = por %p741_p13, %p740_p12 }
  0x20   :  { %p743_p1 = pnand %p742_p0, %p736_p11 }
  0x22   :  { %746 = shalt.err (!%p743_p1)
}
  0x23   :  { %28 = dma.hbm_to_vmem [thread:$0]  %s989_s0, 256, %s873_s30, [#allocation5], %s823_s17, %s823_s17, %s824_s18  }
  0x24   :  { %s825_s9 = smov [#allocation9]   ;;  %s826_s11 = smov [#allocation10]  }
  0x25   :  { %s46_s10 = sshll.u32 %s825_s9, 4  ;;  %s60_s12 = sshll.u32 %s826_s11, 4  ;;  %s47_s10 = int_to_ptr.vmem [resolvable:$true] %s46_s10  ;;  %s910_s12 = int_to_ptr.vmem [resolvable:$true] %s60_s12 }
  0x26   :  { %s747_s15 = scalar_lea.hbm %s991_s2, 512 }
  0x27   :  { %p748_p2 = scmp.ne.s32.totalorder %s991_s2, %s747_s15  ;;  %p751_p3 = scmp.lt.u32.totalorder %s747_s15, %s991_s2 }
  0x29   :  { %p753_p4 = pnand %p751_p3, %p748_p2 }
  0x2b   :  { %756 = shalt.err (!%p753_p4)
}
  0x2c   :  { %s757_s0 = scalar_lea.vmem %s47_s10, 512  ;;  %p762_p6 = scmp.lt.s32.totalorder %s47_s10, %s47_s10 }
  0x2d   :  { %p758_p5 = scmp.ne.s32.totalorder %s47_s10, %s757_s0  ;;  %p763_p7 = scmp.lt.s32.totalorder %s757_s0, %s757_s0 }
  0x2f   :  { %p764_p8 = por %p763_p7, %p762_p6 }
  0x31   :  { %p765_p9 = pnand %p764_p8, %p758_p5 }
  0x33   :  { %768 = shalt.err (!%p765_p9)
}
  0x34   :  { %52 = dma.hbm_to_vmem [thread:$0]  %s991_s2, 512, %s47_s10, [#allocation8], %s823_s17, %s823_s17, %s824_s18  }
  0x35   :  { %s769_s25 = scalar_lea.hbm %s993_s4, 512 }
  0x36   :  { %p770_p10 = scmp.ne.s32.totalorder %s993_s4, %s769_s25  ;;  %p773_p11 = scmp.lt.u32.totalorder %s769_s25, %s993_s4 }
  0x38   :  { %p775_p12 = pnand %p773_p11, %p770_p10 }
  0x3a   :  { %778 = shalt.err (!%p775_p12)
}
  0x3b   :  { %s779_s28 = scalar_lea.vmem %s910_s12, 512  ;;  %p784_p0 = scmp.lt.s32.totalorder %s910_s12, %s910_s12 }
  0x3c   :  { %p780_p13 = scmp.ne.s32.totalorder %s910_s12, %s779_s28  ;;  %p785_p1 = scmp.lt.s32.totalorder %s779_s28, %s779_s28 }
  0x3e   :  { %p786_p2 = por %p785_p1, %p784_p0 }
  0x40   :  { %p787_p3 = pnand %p786_p2, %p780_p13 }
  0x42   :  { %790 = shalt.err (!%p787_p3)
}
  0x43   :  { %66 = dma.hbm_to_vmem [thread:$0]  %s993_s4, 512, %s910_s12, [#allocation11], %s823_s17, %s823_s17, %s824_s18  }
  0x44   :  { %813 = dma.done.wait [#allocation5], 256  }
  0x45   :  { %814 = vsyncadd [#allocation5], 4294967040 }
  0x46   :  { %815 = dma.done.wait [#allocation8], 768  }
  0x47   :  { %816 = vsyncadd [#allocation8], 4294966528 }
  0x48   :  { %817 = dma.done.wait [#allocation11], 512  }
  0x49   :  { %818 = vsyncadd [#allocation11], 4294966784  ;;  %v91_v0 = vld [vmem:[#allocation10] sm:$0xff]  ;;  %v92_v1 = vld [vmem:[#allocation10 + $0x8] sm:$0xff]  ;;  %vm102_vm0 = vcmask 261120   ;;  %vm195_vm1 = vcmask 130048  }
  0x4a   :  { %v93_v2 = vld [vmem:[#allocation10 + $0x10] sm:$0xff]  ;;  %v660_v3 = vpack.c.bf16 %v92_v1, %v91_v0  ;;  %v94_v4 = vld [vmem:[#allocation10 + $0x18] sm:$0xff]  ;;  %v186_v5 = vld [vmem:[%s995_s6] sm:$0xff] }
  0x4b   :  { %v187_v6 = vld [vmem:[%s995_s6 + $0x8] sm:$0xff]  ;;  %v664_v7 = vpack.c.bf16 %v94_v4, %v93_v2  ;;  %v89_v9 = vld [vmem:[#allocation4] sm:$0xff]  ;;  %v184_v10 = vld [vmem:[#allocation7] sm:$0xff] }
  0x4c   :  { %v668_v8 = vpack.c.bf16 %v187_v6, %v186_v5  ;;  %661 = vmatprep.subr.bf16.mxu0 %v660_v3  ;;  %625 = vmatprep.mubr.msk.f32.mxu0 %vm102_vm0, %v89_v9  ;;  %v285_v11 = vld [vmem:[#allocation9] sm:$0xff]  ;;  %v286_v12 = vld [vmem:[#allocation9 + $0x8] sm:$0xff]  ;;  %v287_v14 = vld [vmem:[#allocation9 + $0x10] sm:$0xff] }
  0x4d   :  { %663 = vmatpush3.bf16.msra.mxu0 %v660_v3  ;;  %v672_v13 = vpack.c.bf16 %v286_v12, %v285_v11  ;;  %v288_v15 = vld [vmem:[#allocation9 + $0x18] sm:$0xff]  ;;  %632 = vmatprep.mubr.msk.f32.mxu1 %vm195_vm1, %v184_v10  ;;  %v90_v18 = vld [vmem:[#allocation4 + $0x8] sm:$0xff]  ;;  %v585_v19 = vld [vmem:[%s996_s7] ss:$0 sm:$0xff] }
  0x4e   :  { %669 = vmatprep.subr.bf16.mxu1 %v668_v8  ;;  %665 = vmatprep.subr.bf16.mxu0 %v664_v7  ;;  %v185_v16 = vld [vmem:[#allocation7 + $0x8] sm:$0xff]  ;;  %v676_v17 = vpack.c.bf16 %v288_v15, %v287_v14  ;;  %v582_v21 = vld [vmem:[%s994_s5] ss:$0 sm:$0xff] }
  0x4f   :  { %671 = vmatpush3.bf16.msra.mxu1 %v668_v8  ;;  %v588_v31 = vld [vmem:[%s992_s3] ss:$0 sm:$0xff]  ;;  %s827_s3 = smov [#allocation12]  }
  0x50   :  { %673 = vmatprep.subr.bf16.mxu1 %v672_v13  ;;  %s568_s5 = sshll.u32 %s827_s3, 4  ;;  %s569_s5 = int_to_ptr.vmem [resolvable:$true] %s568_s5 }
  0x51   :  { %667 = vmatpush3.bf16.msra.mxu0 %v664_v7  ;;  %s791_s7 = scalar_lea.vmem %s569_s5, 256  ;;  %p796_p5 = scmp.lt.s32.totalorder %s569_s5, %s569_s5 }
  0x52   :  { %633 = vmatmul.mubr.msk.f32.vlgmr.msra.gmra.mrb[0].mxu1 %vm195_vm1, %v185_v16  ;;  %p792_p4 = scmp.ne.s32.totalorder %s569_s5, %s791_s7  ;;  %p797_p6 = scmp.lt.s32.totalorder %s791_s7, %s791_s7 }
  0x53   :  { %675 = vmatpush3.bf16.msra.mxu1 %v672_v13  ;;  %643 = vmatprep.mubr.msk.f32.mxu1 %vm102_vm0, %v89_v9 }
  0x54   :  { %677 = vmatprep.subr.bf16.mxu1 %v676_v17  ;;  %626 = vmatmul.mubr.msk.f32.vlgmr.msra.gmra.mrb[0].mxu0 %vm102_vm0, %v90_v18  ;;  %p798_p7 = por %p797_p6, %p796_p5 }
  0x56   :  { %p799_p8 = pnand %p798_p7, %p792_p4 }
  0x57   :  { %679 = vmatpush3.bf16.msra.mxu1 %v676_v17 }
  0x5a   :  { %644 = vmatmul.mubr.msk.f32.vlgmr.msra.gmra.mrb[2].mxu1 %vm102_vm0, %v90_v18 }
 0x125   :  { %v634_v20 = vpop.f32.mrb[0].mxu1 }
 0x126   :  { %v274_v22 = vadd.f32 %v634_v20, %v585_v19  ;;  %v268_v23 = vpop.f32.mrb[1].mxu1 }
 0x127   :  { %v269_v24 = vadd.f32 %v585_v19, %v268_v23  ;;  %v627_v25 = vpop.f32.mrb[0].mxu0 }
 0x128   :  { %v181_v26 = vadd.f32 %v627_v25, %v582_v21  ;;  %v175_v27 = vpop.f32.mrb[1].mxu0 }
 0x129   :  { %v684_v28 = vpack.c.bf16 %v274_v22, %v269_v24  ;;  %v176_v29 = vadd.f32 %v582_v21, %v175_v27 }
 0x12b   :  { %685 = vmatprep.subr.bf16.mxu1 %v684_v28  ;;  %v680_v30 = vpack.c.bf16 %v181_v26, %v176_v29 }
 0x12c   :  { %687 = vmatpush3.bf16.msra.mxu1 %v684_v28 }
 0x12d   :  { %v645_v32 = vpop.f32.mrb[2].mxu1  ;;  %681 = vmatprep.subr.bf16.mxu0 %v680_v30 }
 0x12e   :  { %v369_v33 = vpop.f32.mrb[3].mxu1  ;;  %683 = vmatpush3.bf16.xpose.msra.mxu0 %v680_v30  ;;  %v375_v35 = vadd.f32 %v645_v32, %v588_v31 }
 0x12f   :  { %v370_v34 = vadd.f32 %v588_v31, %v369_v33 }
 0x131   :  { %650 = vmatprep.mubr.f32.mxu0 %v370_v34 }
 0x135   :  { %651 = vmatmul.mubr.f32.vlgmr.msra.gmra.mrb[2].mxu0 %v375_v35 }
 0x208   :  { %v652_v36 = vpop.f32.mrb[2].mxu0 }
 0x209   :  { %v446_v37 = vpop.f32.mrb[3].mxu0  ;;  %v459_v39 = vsel %vm195_vm1, %v652_v36, -inf }
 0x20a   :  { %v456_v38 = vsel %vm195_vm1, %v446_v37, -inf }
 0x20b   :  { %457 = vmax.xlane.f32.xlu0 %v456_v38 }
 0x20f   :  { %460 = vmax.xlane.f32.xlu0 %v459_v39 }
 0x298   :  { %v458_v40 = vpop.xlane.xlu0 %457 }
 0x299   :  { %v462_v41 = vsub.f32 %v446_v37, %v458_v40 }
 0x29b   :  { %v464_v42 = vmul.f32 1.442695, %v462_v41 }
 0x29c   :  { %v461_v43 = vpop.xlane.xlu0 %460 }
 0x29d   :  { %695 = vpow2.f32 %v464_v42  ;;  %v463_v44 = vsub.f32 %v652_v36, %v461_v43 }
 0x29f   :  { %v466_v45 = vmul.f32 1.442695, %v463_v44 }
 0x2a1   :  { %697 = vpow2.f32 %v466_v45 }
 0x2a7   :  { %v696_v46 = vpop.eup %695 }
 0x2a8   :  { %v468_v47 = vsel %vm195_vm1, %v696_v46, 0.0 }
 0x2a9   :  { %469 = vadd.xlane.f32.xlu1 %v468_v47 }
 0x2ab   :  { %v698_v48 = vpop.eup %697 }
 0x2ac   :  { %v471_v49 = vsel %vm195_vm1, %v698_v48, 0.0 }
 0x2ad   :  { %472 = vadd.xlane.f32.xlu1 %v471_v49 }
 0x336   :  { %v470_v50 = vpop.xlane.xlu1 %469 }
 0x337   :  { %699 = vrcp.f32 %v470_v50 }
 0x33a   :  { %v473_v51 = vpop.xlane.xlu1 %472 }
 0x33b   :  { %701 = vrcp.f32 %v473_v51 }
 0x341   :  { %v700_v52 = vpop.eup %699 }
 0x342   :  { %v475_v53 = vmul.f32 %v700_v52, %v696_v46 }
 0x344   :  { %657 = vmatprep.mubr.msk.f32.mxu1 %vm195_vm1, %v475_v53 }
 0x345   :  { %v702_v54 = vpop.eup %701 }
 0x346   :  { %v477_v55 = vmul.f32 %v702_v54, %v698_v48 }
 0x348   :  { %658 = vmatmul.mubr.msk.f32.vlgmr.msra.gmra.mrb[4].mxu1 %vm195_vm1, %v477_v55 }
 0x41b   :  { %v659_v56 = vpop.f32.mrb[4].mxu1 }
 0x41c   :  { %562 = vst [vmem:[#allocation12 + $0x8] sm:$0xff] %v659_v56  ;;  %v552_v57 = vpop.f32.mrb[5].mxu1 }
 0x41d   :  { %561 = vst [vmem:[#allocation12] sm:$0xff] %v552_v57 }
 0x41e   :  { %802 = shalt.err (!%p799_p8)
}
 0x41f   :  { %s803_s0 = scalar_lea.hbm %s997_s8, 256 }
 0x420   :  { %p804_p9 = scmp.ne.s32.totalorder %s997_s8, %s803_s0  ;;  %p807_p10 = scmp.lt.u32.totalorder %s803_s0, %s997_s8 }
 0x422   :  { %p809_p11 = pnand %p807_p10, %p804_p9 }
 0x424   :  { %812 = shalt.err (!%p809_p11)
}
 0x425   :  { %574 = dma.vmem_to_hbm [thread:$0]  %s569_s5, 256, %s997_s8, [#allocation6], %s823_s17, %s823_s17, %s824_s18  }
 0x426   :  { %819 = dma.done.wait [#allocation6], 256  }
 0x427   :  { %820 = vsyncadd [#allocation6], 4294967040 }
 0x428   :  { %578 = vsyncpa [#allocation5], 1 }
 0x429   :  { %579 = vsyncpa [#allocation8], 1 }
 0x42a   :  { %580 = vsyncpa [#allocation11], 1 }
 0x42b   :  { %581 = vsyncpa [#allocation6], 1 }

</bundles_post_ra>
